<compile_context>
chip_gen: v5e
topology: v5e:2x2
jax: 0.10.0
libtpu: 0.0.40
codegen_flags: <defaults>
</compile_context>

<pallas_src>
import jax
import jax.numpy as jnp
from jax.experimental import pallas as pl
from jax.experimental.pallas import tpu as pltpu


def _round_up(x: int, m: int) -> int:
    return ((x + m - 1) // m) * m


def _skip_linear_kernel(x_ref, w_ref, b_ref, o_ref):
    # x_ref: (tm, H) f32 | w_ref: (H, tn) bf16 | b_ref: (1, tn) f32 | o_ref: (tm, tn)
    j = pl.program_id(1)
    tn = o_ref.shape[1]

    x = x_ref[...]                                           # f32 activations
    # bf16 MXU matmul, f32 accumulation.
    y = jnp.dot(x.astype(jnp.bfloat16), w_ref[...],
                preferred_element_type=jnp.float32)
    y = y + b_ref[...]                                       # bias (VPU, hidden under MXU)

    # Residual add in f32 using the columns of x that correspond to this N tile.
    col0 = pl.multiple_of(j * tn, 128)
    x_res = x_ref[:, pl.ds(col0, tn)]
    o_ref[...] = (y + x_res).astype(o_ref.dtype)


def skip_layer(x, weight, bias, *, tm=512, tn=512):
    """x: (B, S, H) f32; weight: (H_out=H, H_in=H) as in nn.Linear; bias: (H,)."""
    B, S, H = x.shape
    M = B * S
    x2 = x.reshape(M, H)

    # --- N tile: multiple of 128 that divides H (else full H). ---
    tn = next((c for c in (tn, 512, 256, 128)
               if c <= H and H % c == 0 and c % 128 == 0), H)

    # --- M tile: multiple of 8, clamped to the (padded) row count. ---
    tm = max(8, min(_round_up(tm, 8), _round_up(M, 8)))
    Mp = _round_up(M, tm)
    if Mp != M:
        x2 = jnp.pad(x2, ((0, Mp - M), (0, 0)))

    # nn.Linear does y = x @ W.T + b; pre-transpose once, store bf16 to halve DMA.
    w_bf16 = weight.T.astype(jnp.bfloat16)          # (H_in, H_out)
    b2 = bias.reshape(1, H).astype(jnp.float32)

    grid = (Mp // tm, H // tn)

    # Explicit VMEM budget: double-buffered x / w / out tiles + bias + headroom.
    vmem_bytes = (2 * tm * H * 4        # x tiles (f32)
                  + 2 * H * tn * 2      # weight tiles (bf16)
                  + 2 * tm * tn * 4     # output tiles (f32)
                  + 2 * tn * 4          # bias
                  + (2 << 20))          # headroom
    vmem_bytes = min(max(vmem_bytes, 4 << 20), 100 << 20)

    out = pl.pallas_call(
        _skip_linear_kernel,
        out_shape=jax.ShapeDtypeStruct((Mp, H), x.dtype),
        grid_spec=pltpu.PrefetchScalarGridSpec(
            num_scalar_prefetch=0,
            grid=grid,
            in_specs=[
                pl.BlockSpec((tm, H), lambda i, j: (i, 0)),   # x row tile (full K)
                pl.BlockSpec((H, tn), lambda i, j: (0, j)),   # weight N slab
                pl.BlockSpec((1, tn), lambda i, j: (0, j)),   # bias N slab
            ],
            out_specs=pl.BlockSpec((tm, tn), lambda i, j: (i, j)),
        ),
        compiler_params=pltpu.CompilerParams(
            dimension_semantics=("parallel", "parallel"),
            vmem_limit_bytes=vmem_bytes,
        ),
    )(x2, w_bf16, b2)

    return out[:M].reshape(B, S, H)
    # TODO(synk): for very large H (>~8K) also tile K with an f32 VMEM accumulator
    # and an "arbitrary" reduction axis; unnecessary at these hidden sizes.


def _reference(x, weight, bias):
    return x @ weight.T + bias + x


if __name__ == "__main__":
    key = jax.random.PRNGKey(0)
    k_x, k_w, k_b, k_x2 = jax.random.split(key, 4)

    H = 128
    bound = 1.0 / (H ** 0.5)
    weight = jax.random.uniform(k_w, (H, H), minval=-bound, maxval=bound,
                                dtype=jnp.float32)
    bias = jax.random.uniform(k_b, (H,), minval=-bound, maxval=bound,
                              dtype=jnp.float32)

    # Case 1: nicely shaped batch.
    B, S = 2, 8
    x = jax.random.normal(k_x, (B, S, H), dtype=jnp.float32)
    out = jax.block_until_ready(skip_layer(x, weight, bias))
    ref = _reference(x, weight, bias)
    assert out.shape == x.shape
    assert jnp.allclose(out, ref, atol=2e-2, rtol=2e-2), "mismatch vs reference (case 1)"

    # Case 2: ragged row count (exercises padding + slicing path).
    B2, S2 = 3, 5
    x2 = jax.random.normal(k_x2, (B2, S2, H), dtype=jnp.float32)
    out2 = jax.block_until_ready(skip_layer(x2, weight, bias))
    ref2 = _reference(x2, weight, bias)
    assert out2.shape == x2.shape
    assert jnp.allclose(out2, ref2, atol=2e-2, rtol=2e-2), "mismatch vs reference (case 2)"

    print("KERNEL_OK")
</pallas_src>

<mosaic_0001>
module attributes {stable_mosaic.version = 11 : i64} {
  func.func @_skip_linear_kernel(%arg0: i32, %arg1: i32, %arg2: memref<16x128xf32, #tpu.memory_space<vmem>>, %arg3: memref<128x128xbf16, #tpu.memory_space<vmem>>, %arg4: memref<1x128xf32, #tpu.memory_space<vmem>>, %arg5: memref<16x128xf32, #tpu.memory_space<vmem>>) attributes {dimension_semantics = [#tpu.dimension_semantics<parallel>, #tpu.dimension_semantics<parallel>], iteration_bounds = array<i64: 1, 1>, scalar_prefetch = 0 : i64, scratch_operands = 0 : i64, tpu.core_type = #tpu.core_type<tc>, window_params = [{transform_indices = @transform_0, window_bounds = array<i64: 16, 128>}, {transform_indices = @transform_1, window_bounds = array<i64: 128, 128>}, {transform_indices = @transform_2, window_bounds = array<i64: 1, 128>}, {transform_indices = @transform_3, window_bounds = array<i64: 16, 128>}]} {
    %c0 = arith.constant 0 : index
    %c0_0 = arith.constant 0 : index
    %0 = vector.load %arg2[%c0, %c0_0] : memref<16x128xf32, #tpu.memory_space<vmem>>, vector<16x128xf32>
    %1 = arith.truncf %0 : vector<16x128xf32> to vector<16x128xbf16>
    %c0_1 = arith.constant 0 : index
    %c0_2 = arith.constant 0 : index
    %2 = vector.load %arg3[%c0_1, %c0_2] : memref<128x128xbf16, #tpu.memory_space<vmem>>, vector<128x128xbf16>
    %cst = arith.constant dense<0.000000e+00> : vector<16x128xf32>
    %3 = tpu.matmul %1, %2, %cst {dimension_numbers = #tpu.dot_dimension_numbers<[1], [0], [0], [1], [0, 0, 1, 1], [], []>} : vector<16x128xbf16>, vector<128x128xbf16>, vector<16x128xf32> -> vector<16x128xf32>
    %c0_3 = arith.constant 0 : index
    %c0_4 = arith.constant 0 : index
    %4 = vector.load %arg4[%c0_3, %c0_4] : memref<1x128xf32, #tpu.memory_space<vmem>>, vector<1x128xf32>
    %5 = vector.broadcast %4 : vector<1x128xf32> to vector<16x128xf32>
    %6 = arith.addf %3, %5 : vector<16x128xf32>
    %c128_i32 = arith.constant 128 : i32
    %7 = arith.muli %arg1, %c128_i32 : i32
    %8 = tpu.assume_multiple %7, 128 : i32
    %c0_5 = arith.constant 0 : index
    %9 = arith.index_cast %8 : i32 to index
    %10 = vector.load %arg2[%c0_5, %9] : memref<16x128xf32, #tpu.memory_space<vmem>>, vector<16x128xf32>
    %11 = arith.addf %6, %10 : vector<16x128xf32>
    %c0_6 = arith.constant 0 : index
    %c0_7 = arith.constant 0 : index
    %12 = vector.load %arg5[%c0_6, %c0_7] : memref<16x128xf32, #tpu.memory_space<vmem>>, vector<16x128xf32>
    tpu.vector_store %arg5[%c0_6, %c0_7], %11 {strides = array<i32>} : memref<16x128xf32, #tpu.memory_space<vmem>>, vector<16x128xf32>,
    return
  }
  func.func @transform_0(%arg0: i32, %arg1: i32) -> (i32, i32) {
    %c0_i32 = arith.constant 0 : i32
    %c0_i32_0 = arith.constant 0 : i32
    return %arg0, %c0_i32 : i32, i32
  }
  func.func @transform_1(%arg0: i32, %arg1: i32) -> (i32, i32) {
    %c0_i32 = arith.constant 0 : i32
    %c0_i32_0 = arith.constant 0 : i32
    return %c0_i32, %arg1 : i32, i32
  }
  func.func @transform_2(%arg0: i32, %arg1: i32) -> (i32, i32) {
    %c0_i32 = arith.constant 0 : i32
    %c0_i32_0 = arith.constant 0 : i32
    return %c0_i32, %arg1 : i32, i32
  }
  func.func @transform_3(%arg0: i32, %arg1: i32) -> (i32, i32) {
    %c0_i32 = arith.constant 0 : i32
    return %arg0, %arg1 : i32, i32
  }
}

</mosaic_0001>

<bundles_post_ra>
// kernel: tpu_custom_call.1
= control target key start
LH: loop header
LB: loop body
LE: loop exit
PB: predicated region body
PF: predicated region fallthrough
CT: control target
= control target key end

     0   :  { %8 = vsyncpa [#allocation3], 0  ;;  %s334_s0 = inlined_call_operand.hbm [shape: f32[16,128], index: 0, kind: input, shape index: {}]   ;;  %s335_s1 = inlined_call_operand.hbm [shape: bf16[128,128], index: 1, kind: input, shape index: {}]   ;;  %s336_s2 = inlined_call_operand.vmem [shape: f32[1,128], index: 2, kind: input, shape index: {}]   ;;  %s337_s3 = inlined_call_operand.hbm [shape: f32[16,128], index: 3, kind: output, shape index: {}]  }
   0x1   :  { %9 = vsyncpa [#allocation6], 0 }
   0x2   :  { %10 = vsyncpa [#allocation4], 0  ;;  %s15_s14 = sshll.u32 %s334_s0, 4  ;;  %s289_s15 = smov [#allocation2]   ;;  %s16_s14 = int_to_ptr.hbm [resolvable:$true] %s15_s14 }
   0x3   :  { %s17_s16 = sshll.u32 %s289_s15, 4  ;;  %s28_s19 = sshll.u32 %s335_s1, 4  ;;  %s18_s16 = int_to_ptr.vmem [resolvable:$true] %s17_s16  ;;  %s29_s19 = int_to_ptr.hbm [resolvable:$true] %s28_s19 }
   0x4   :  { %s290_s20 = smov 128   ;;  %s291_s21 = smov 8  }
   0x5   :  { %23 = dma.hbm_to_vmem [thread:$0]  %s16_s14, 256, %s18_s16, [#allocation3], %s290_s20, %s290_s20, %s291_s21  }
   0x6   :  { %s292_s22 = smov [#allocation5]   ;;  %s293_s24 = smov 64  }
   0x7   :  { %s30_s23 = sshll.u32 %s292_s22, 4  ;;  %s294_s0 = smov 4   ;;  %s31_s23 = int_to_ptr.vmem [resolvable:$true] %s30_s23 }
   0x8   :  { %36 = dma.hbm_to_vmem [thread:$0]  %s29_s19, 1024, %s31_s23, [#allocation6], %s293_s24, %s293_s24, %s294_s0  }
   0x9   :  { %283 = dma.done.wait [#allocation3], 256  }
   0xa   :  { %284 = vsyncadd [#allocation3], 4294967040 }
   0xb   :  { %285 = dma.done.wait [#allocation6], 1024  }
   0xc   :  { %286 = vsyncadd [#allocation6], 4294966272  ;;  %v202_v0 = vld [vmem:[#allocation5 + $0x38] sm:$0xff]  ;;  %v201_v1 = vld [vmem:[#allocation5 + $0x30] sm:$0xff]  ;;  %s295_s26 = smov [#allocation7]   ;;  %s148_s30 = sshll.u32 %s337_s3, 4  ;;  %s149_s30 = int_to_ptr.hbm [resolvable:$true] %s148_s30 }
   0xd   :  { %118 = vmatpush.bf16.msra.mxu0 %v202_v0  ;;  %v200_v2 = vld [vmem:[#allocation5 + $0x28] sm:$0xff]  ;;  %v199_v3 = vld [vmem:[#allocation5 + $0x20] sm:$0xff]  ;;  %v198_v4 = vld [vmem:[#allocation5 + $0x18] sm:$0xff]  ;;  %s146_s27 = sshll.u32 %s295_s26, 4  ;;  %s147_s27 = int_to_ptr.vmem [resolvable:$true] %s146_s27 }
   0xe   :  { %v197_v5 = vld [vmem:[#allocation5 + $0x10] sm:$0xff]  ;;  %v196_v6 = vld [vmem:[#allocation5 + $0x8] sm:$0xff]  ;;  %v195_v7 = vld [vmem:[#allocation5] sm:$0xff] }
   0xf   :  { %v47_v8 = vld [vmem:[#allocation2] sm:$0xff]  ;;  %v48_v9 = vld [vmem:[#allocation2 + $0x8] sm:$0xff] }
  0x10   :  { %v49_v10 = vpack.c.bf16 %v48_v9, %v47_v8  ;;  %v210_v11 = vld [vmem:[%s336_s2] ss:$0 sm:$0xff] }
  0x11   :  { %119 = vmatpush.bf16.msra.mxu0 %v201_v1 }
  0x15   :  { %120 = vmatpush.bf16.msra.mxu0 %v200_v2 }
  0x19   :  { %121 = vmatpush.bf16.msra.mxu0 %v199_v3 }
  0x1d   :  { %122 = vmatpush.bf16.msra.mxu0 %v198_v4 }
  0x21   :  { %123 = vmatpush.bf16.msra.mxu0 %v197_v5 }
  0x25   :  { %124 = vmatpush.bf16.msra.mxu0 %v196_v6 }
  0x29   :  { %125 = vmatpush.bf16.msra.mxu0 %v195_v7 }
  0x2c   :  { %126 = vmatmul.bf16.vlgmr.msra.gmra.mxu0 %v49_v10 }
  0xa9   :  { %v127_v12 = vpop.f32.mrf.mxu0 }
  0xaa   :  { %v128_v13 = vadd.f32 %v210_v11, %v127_v12 }
  0xac   :  { %v138_v14 = vadd.f32 %v128_v13, %v47_v8 }
  0xae   :  { %140 = vst [vmem:[#allocation7] sm:$0xff] %v138_v14 }
  0xb1   :  { %v129_v15 = vpop.f32.mrf.mxu0 }
  0xb2   :  { %v130_v16 = vadd.f32 %v210_v11, %v129_v15 }
  0xb4   :  { %v139_v17 = vadd.f32 %v130_v16, %v48_v9 }
  0xb6   :  { %141 = vst [vmem:[#allocation7 + $0x8] sm:$0xff] %v139_v17 }
  0xb7   :  { %154 = dma.vmem_to_hbm [thread:$0]  %s147_s27, 256, %s149_s30, [#allocation4], %s290_s20, %s290_s20, %s291_s21  }
  0xb8   :  { %287 = dma.done.wait [#allocation4], 256  }
  0xb9   :  { %288 = vsyncadd [#allocation4], 4294967040 }
  0xba   :  { %159 = vsyncpa [#allocation3], 1 }
  0xbb   :  { %160 = vsyncpa [#allocation6], 1 }
  0xbc   :  { %161 = vsyncpa [#allocation4], 1 }

</bundles_post_ra>
